<compile_context>
chip_gen: v5e
topology: v5e:2x2
jax: 0.10.0
libtpu: 0.0.40
codegen_flags: <defaults>
</compile_context>

<pallas_src>
import math

import jax
import jax.numpy as jnp
from jax.experimental import pallas as pl
from jax.experimental.pallas import tpu as pltpu


# ------------------------------ helpers --------------------------------------

def _round_up(x, m):
    return ((x + m - 1) // m) * m


def _sublane_multiple(dtype):
    itemsize = jnp.dtype(dtype).itemsize
    if itemsize >= 4:
        return 8
    if itemsize == 2:
        return 16
    return 32


def _pick_tile(dim, candidates):
    """Pick the tile from `candidates` minimizing padding (tie -> largest tile)."""
    best_t, best_pad = None, None
    for t in candidates:
        pad = _round_up(dim, t)
        if best_pad is None or pad < best_pad:
            best_t, best_pad = t, pad
    return best_t, best_pad


# ------------------------------ kernels --------------------------------------

def _linear_kernel_fullk(x_ref, wt_ref, b_ref, o_ref):
    # Grid = (M tiles, N tiles). Whole reduction resident in VMEM:
    # one streamed MXU matmul per (i, j) tile, bias add fused, no scratch.
    acc = jnp.dot(x_ref[...], wt_ref[...], preferred_element_type=jnp.float32)
    o_ref[...] = (acc + b_ref[...]).astype(o_ref.dtype)


def _linear_kernel_ktiled(x_ref, wt_ref, b_ref, o_ref, acc_ref):
    # Grid = (M tiles, N tiles, K tiles); K (reduction) is the last axis.
    k = pl.program_id(2)

    @pl.when(k == 0)
    def _init():
        # Seed the accumulator with the bias: finalize becomes a pure cast+store.
        acc_ref[...] = jnp.broadcast_to(b_ref[...], acc_ref.shape).astype(jnp.float32)

    acc_ref[...] += jnp.dot(x_ref[...], wt_ref[...],
                            preferred_element_type=jnp.float32)

    @pl.when(k == pl.num_programs(2) - 1)
    def _finalize():
        o_ref[...] = acc_ref[...].astype(o_ref.dtype)


# ------------------------------ parameter prep -------------------------------

def prepare_linear_params(w, b, *, compute_dtype=None,
                          vmem_budget_bytes=36 * 1024 * 1024):
    """One-time weight preparation (call at parameter-init time, NOT per forward).

    w: (OUT, IN) in PyTorch nn.Linear layout, b: (OUT,).
    Transposes and pads W exactly once so the per-call path streams it directly.
    """
    OUT, IN = w.shape
    cdtype = jnp.dtype(compute_dtype) if compute_dtype is not None else jnp.dtype(w.dtype)
    isz = cdtype.itemsize

    # N tile: multiple of 128 (lane-dense unmasked stores); 256+ preferred for the
    # 2x256x256 MXU on v6e/v7x, but never at the cost of large OUT padding.
    tn, Np = _pick_tile(OUT, (512, 384, 256, 128))

    # K handling: keep the whole (padded) reduction in VMEM when it fits next to
    # the W tile -> drop the K grid axis entirely (no accumulator RMW).
    tm_max = 256
    Kp_full = _round_up(IN, 128)
    est_full_k = isz * (2 * tm_max * Kp_full + 2 * Kp_full * tn) + 4 * 2 * tm_max * tn
    if est_full_k <= vmem_budget_bytes:
        tk, Kp = Kp_full, Kp_full
    else:
        tk, _ = _pick_tile(IN, (1024, 512, 256))
        Kp = _round_up(IN, tk)

    wt_p = jnp.pad(w.astype(cdtype).T, ((0, Kp - IN), (0, Np - OUT)))
    b_p = jnp.pad(b.astype(jnp.float32), (0, Np - OUT)).reshape(1, Np)

    return dict(wt_p=wt_p, b_p=b_p, IN=IN, OUT=OUT,
                Kp=Kp, Np=Np, tk=tk, tn=tn, compute_dtype=cdtype)


# ------------------------------ forward ---------------------------------------

def linear_forward(x, params, *, force_pallas=False, min_flops_for_pallas=1 << 22):
    """out = x @ W.T + b using pre-prepared (transposed/padded) parameters."""
    IN, OUT = params["IN"], params["OUT"]
    Kp, Np = params["Kp"], params["Np"]
    tk, tn = params["tk"], params["tn"]
    cdtype = params["compute_dtype"]
    wt_p, b_p = params["wt_p"], params["b_p"]

    lead = x.shape[:-1]
    assert x.shape[-1] == IN
    B = int(math.prod(lead)) if lead else 1
    x2 = x.reshape(B, IN)

    # Tiny problems: fixed pallas_call + pad/slice overhead dominates; let XLA's
    # fused GEMM handle them unless the caller insists on the kernel.
    if not force_pallas and 2 * B * IN * OUT < min_flops_for_pallas:
        out = jnp.dot(x2.astype(cdtype), wt_p[:IN, :OUT],
                      preferred_element_type=jnp.float32) + b_p[0, :OUT]
        return out.astype(x.dtype).reshape(*lead, OUT)

    isz = jnp.dtype(cdtype).itemsize
    osz = jnp.dtype(x.dtype).itemsize
    sub = _sublane_multiple(cdtype)

    tm_cands = [c for c in (256, 192, 128, 64, 32, 16, 8) if c % sub == 0]
    tm, _ = _pick_tile(max(B, sub), tm_cands)
    Mp = _round_up(B, tm)

    # v7x has 2 TensorCores: ensure at least one parallel axis has >= 2 tiles
    # when the problem shape allows it.
    if Mp // tm == 1 and Np // tn == 1 and Np >= 256 and (Np // 2) % 128 == 0:
        tn = Np // 2

    x_p = jnp.pad(x2.astype(cdtype), ((0, Mp - B), (0, Kp - IN)))

    m_tiles, n_tiles, k_tiles = Mp // tm, Np // tn, Kp // tk

    if k_tiles == 1:
        grid = (m_tiles, n_tiles)
        in_specs = [
            pl.BlockSpec((tm, Kp), lambda i, j: (i, 0)),    # x: full K resident
            pl.BlockSpec((Kp, tn), lambda i, j: (0, j)),    # W.T tile (streamed)
            pl.BlockSpec((1, tn), lambda i, j: (0, j)),     # bias (N only)
        ]
        out_specs = pl.BlockSpec((tm, tn), lambda i, j: (i, j))
        scratch_shapes = []
        kernel = _linear_kernel_fullk
        semantics = ("parallel", "parallel")
        est = isz * (2 * tm * Kp + 2 * Kp * tn + 2 * tn) + osz * 2 * tm * tn
    else:
        grid = (m_tiles, n_tiles, k_tiles)
        in_specs = [
            pl.BlockSpec((tm, tk), lambda i, j, k: (i, k)),  # x tile
            pl.BlockSpec((tk, tn), lambda i, j, k: (k, j)),  # W.T tile
            pl.BlockSpec((1, tn), lambda i, j, k: (0, j)),   # bias (N only)
        ]
        out_specs = pl.BlockSpec((tm, tn), lambda i, j, k: (i, j))
        scratch_shapes = [pltpu.VMEM((tm, tn), jnp.float32)]
        kernel = _linear_kernel_ktiled
        semantics = ("parallel", "parallel", "arbitrary")
        est = (isz * (2 * tm * tk + 2 * tk * tn + 2 * tn)
               + osz * 2 * tm * tn + 4 * tm * tn)

    # Computed from the actual tile footprint; 48 MiB cap is safe on v7x (64 MiB
    # physical VMEM) as well as v5e/v6e (128 MiB).
    vmem_limit = int(min(max(est + (8 << 20), 32 << 20), 48 << 20))

    out_p = pl.pallas_call(
        kernel,
        out_shape=jax.ShapeDtypeStruct((Mp, Np), x.dtype),
        grid_spec=pltpu.PrefetchScalarGridSpec(
            num_scalar_prefetch=0,
            grid=grid,
            in_specs=in_specs,
            out_specs=out_specs,
            scratch_shapes=scratch_shapes,
        ),
        compiler_params=pltpu.CompilerParams(
            dimension_semantics=semantics,
            vmem_limit_bytes=vmem_limit,
        ),
    )(x_p, wt_p, b_p)

    return out_p[:B, :OUT].reshape(*lead, OUT)


# ------------------------------ demo / check ----------------------------------

def _make_case(key, batch, input_size, output_size):
    kx, kw, kb = jax.random.split(key, 3)
    bound = 1.0 / jnp.sqrt(jnp.float32(input_size))
    w = jax.random.uniform(kw, (output_size, input_size), jnp.float32,
                           minval=-bound, maxval=bound)
    b = jax.random.uniform(kb, (output_size,), jnp.float32,
                           minval=-bound, maxval=bound)
    x = jax.random.normal(kx, (batch, input_size), jnp.float32)
    return x, w, b


if __name__ == "__main__":
    key = jax.random.PRNGKey(0)
    k1, k2, k3 = jax.random.split(key, 3)

    # Case 1: small shapes from the module spec; force the Pallas path
    # (no-K-axis kernel, single (1,1) tile).
    x, w, b = _make_case(k1, batch=8, input_size=32, output_size=16)
    params = prepare_linear_params(w, b)              # one-time weight prep
    out = linear_forward(x, params, force_pallas=True)
    jax.block_until_ready(out)
    ref = x @ w.T + b
    assert out.shape == (8, 16)
    assert jnp.allclose(out, ref, atol=1e-4, rtol=1e-4)

    # Case 2: moderate shapes -> no-K-axis kernel with a multi-tile (M, N) grid.
    x, w, b = _make_case(k2, batch=384, input_size=1024, output_size=1024)
    params = prepare_linear_params(w, b)
    out = linear_forward(x, params)
    jax.block_until_ready(out)
    ref = x @ w.T + b
    assert jnp.allclose(out, ref, atol=1e-4, rtol=1e-4)

    # Case 3: shrink the VMEM budget to exercise the K-tiled accumulator path.
    x, w, b = _make_case(k3, batch=64, input_size=2048, output_size=256)
    params = prepare_linear_params(w, b, vmem_budget_bytes=4 * 1024 * 1024)
    out = linear_forward(x, params)
    jax.block_until_ready(out)
    ref = x @ w.T + b
    assert jnp.allclose(out, ref, atol=1e-4, rtol=1e-4)

    print("KERNEL_OK")
</pallas_src>

<mosaic_0001>
module attributes {stable_mosaic.version = 11 : i64} {
  func.func @_linear_kernel_fullk(%arg0: i32, %arg1: i32, %arg2: memref<8x128xf32, #tpu.memory_space<vmem>>, %arg3: memref<128x128xf32, #tpu.memory_space<vmem>>, %arg4: memref<1x128xf32, #tpu.memory_space<vmem>>, %arg5: memref<8x128xf32, #tpu.memory_space<vmem>>) attributes {dimension_semantics = [#tpu.dimension_semantics<parallel>, #tpu.dimension_semantics<parallel>], iteration_bounds = array<i64: 1, 1>, scalar_prefetch = 0 : i64, scratch_operands = 0 : i64, tpu.core_type = #tpu.core_type<tc>, window_params = [{transform_indices = @transform_0, window_bounds = array<i64: 8, 128>}, {transform_indices = @transform_1, window_bounds = array<i64: 128, 128>}, {transform_indices = @transform_2, window_bounds = array<i64: 1, 128>}, {transform_indices = @transform_3, window_bounds = array<i64: 8, 128>}]} {
    %c0 = arith.constant 0 : index
    %c0_0 = arith.constant 0 : index
    %0 = vector.load %arg2[%c0, %c0_0] : memref<8x128xf32, #tpu.memory_space<vmem>>, vector<8x128xf32>
    %c0_1 = arith.constant 0 : index
    %c0_2 = arith.constant 0 : index
    %1 = vector.load %arg3[%c0_1, %c0_2] : memref<128x128xf32, #tpu.memory_space<vmem>>, vector<128x128xf32>
    %cst = arith.constant dense<0.000000e+00> : vector<8x128xf32>
    %2 = tpu.matmul %0, %1, %cst {dimension_numbers = #tpu.dot_dimension_numbers<[1], [0], [0], [1], [0, 0, 1, 1], [], []>} : vector<8x128xf32>, vector<128x128xf32>, vector<8x128xf32> -> vector<8x128xf32>
    %c0_3 = arith.constant 0 : index
    %c0_4 = arith.constant 0 : index
    %3 = vector.load %arg4[%c0_3, %c0_4] : memref<1x128xf32, #tpu.memory_space<vmem>>, vector<1x128xf32>
    %4 = vector.broadcast %3 : vector<1x128xf32> to vector<8x128xf32>
    %5 = arith.addf %2, %4 : vector<8x128xf32>
    %c0_5 = arith.constant 0 : index
    %c0_6 = arith.constant 0 : index
    %6 = vector.load %arg5[%c0_5, %c0_6] : memref<8x128xf32, #tpu.memory_space<vmem>>, vector<8x128xf32>
    tpu.vector_store %arg5[%c0_5, %c0_6], %5 {strides = array<i32>} : memref<8x128xf32, #tpu.memory_space<vmem>>, vector<8x128xf32>,
    return
  }
  func.func @transform_0(%arg0: i32, %arg1: i32) -> (i32, i32) {
    %c0_i32 = arith.constant 0 : i32
    %c0_i32_0 = arith.constant 0 : i32
    return %arg0, %c0_i32 : i32, i32
  }
  func.func @transform_1(%arg0: i32, %arg1: i32) -> (i32, i32) {
    %c0_i32 = arith.constant 0 : i32
    %c0_i32_0 = arith.constant 0 : i32
    return %c0_i32, %arg1 : i32, i32
  }
  func.func @transform_2(%arg0: i32, %arg1: i32) -> (i32, i32) {
    %c0_i32 = arith.constant 0 : i32
    %c0_i32_0 = arith.constant 0 : i32
    return %c0_i32, %arg1 : i32, i32
  }
  func.func @transform_3(%arg0: i32, %arg1: i32) -> (i32, i32) {
    %c0_i32 = arith.constant 0 : i32
    return %arg0, %arg1 : i32, i32
  }
}

</mosaic_0001>

<bundles_post_ra>
// kernel: tpu_custom_call.1
= control target key start
LH: loop header
LB: loop body
LE: loop exit
PB: predicated region body
PF: predicated region fallthrough
CT: control target
= control target key end

     0   :  { %8 = vsyncpa [#allocation3], 0  ;;  %s226_s0 = inlined_call_operand.hbm [shape: f32[8,128], index: 0, kind: input, shape index: {}]   ;;  %s227_s1 = inlined_call_operand.hbm [shape: f32[128,128], index: 1, kind: input, shape index: {}]   ;;  %s228_s2 = inlined_call_operand.vmem [shape: f32[1,128], index: 2, kind: input, shape index: {}]   ;;  %s229_s3 = inlined_call_operand.hbm [shape: f32[8,128], index: 3, kind: output, shape index: {}]  }
   0x1   :  { %9 = vsyncpa [#allocation6], 0 }
   0x2   :  { %10 = vsyncpa [#allocation4], 0  ;;  %s16_s14 = sshll.u32 %s226_s0, 4  ;;  %s189_s15 = smov [#allocation2]   ;;  %s17_s14 = int_to_ptr.hbm [resolvable:$true] %s16_s14 }
   0x3   :  { %s18_s16 = sshll.u32 %s189_s15, 4  ;;  %s26_s19 = sshll.u32 %s227_s1, 4  ;;  %s19_s16 = int_to_ptr.vmem [resolvable:$true] %s18_s16  ;;  %s27_s19 = int_to_ptr.hbm [resolvable:$true] %s26_s19 }
   0x4   :  { %21 = dma.hbm_to_vmem [thread:$0]  %s17_s14, 128, %s19_s16, [#allocation3]  }
   0x5   :  { %s190_s20 = smov [#allocation5]   ;;  %s191_s22 = smov 128  }
   0x6   :  { %s28_s21 = sshll.u32 %s190_s20, 4  ;;  %s192_s23 = smov 8   ;;  %s29_s21 = int_to_ptr.vmem [resolvable:$true] %s28_s21 }
   0x7   :  { %34 = dma.hbm_to_vmem [thread:$0]  %s27_s19, 2048, %s29_s21, [#allocation6], %s191_s22, %s191_s22, %s192_s23  }
   0x8   :  { %183 = dma.done.wait [#allocation3], 128  }
   0x9   :  { %184 = vsyncadd [#allocation3], 4294967168 }
   0xa   :  { %185 = dma.done.wait [#allocation6], 2048  }
   0xb   :  { %186 = vsyncadd [#allocation6], 4294965248  ;;  %v61_v0 = vld [vmem:[#allocation5 + $0x78] sm:$0xff]  ;;  %v60_v1 = vld [vmem:[#allocation5 + $0x70] sm:$0xff]  ;;  %s193_s24 = smov [#allocation7]   ;;  %s94_s28 = sshll.u32 %s229_s3, 4  ;;  %s95_s28 = int_to_ptr.hbm [resolvable:$true] %s94_s28 }
   0xc   :  { %66 = vmatpush.msra.mxu0 %v61_v0  ;;  %v59_v2 = vld [vmem:[#allocation5 + $0x68] sm:$0xff]  ;;  %v58_v3 = vld [vmem:[#allocation5 + $0x60] sm:$0xff]  ;;  %v57_v4 = vld [vmem:[#allocation5 + $0x58] sm:$0xff]  ;;  %s92_s25 = sshll.u32 %s193_s24, 4  ;;  %s93_s25 = int_to_ptr.vmem [resolvable:$true] %s92_s25 }
   0xd   :  { %v56_v5 = vld [vmem:[#allocation5 + $0x50] sm:$0xff]  ;;  %v55_v6 = vld [vmem:[#allocation5 + $0x48] sm:$0xff]  ;;  %v54_v7 = vld [vmem:[#allocation5 + $0x40] sm:$0xff] }
   0xe   :  { %67 = vmatpush.msra.mxu0 %v60_v1  ;;  %v53_v8 = vld [vmem:[#allocation5 + $0x38] sm:$0xff]  ;;  %v52_v9 = vld [vmem:[#allocation5 + $0x30] sm:$0xff]  ;;  %v51_v10 = vld [vmem:[#allocation5 + $0x28] sm:$0xff] }
   0xf   :  { %v50_v11 = vld [vmem:[#allocation5 + $0x20] sm:$0xff]  ;;  %v49_v12 = vld [vmem:[#allocation5 + $0x18] sm:$0xff]  ;;  %v48_v13 = vld [vmem:[#allocation5 + $0x10] sm:$0xff] }
  0x10   :  { %68 = vmatpush.msra.mxu0 %v59_v2  ;;  %v47_v14 = vld [vmem:[#allocation5 + $0x8] sm:$0xff]  ;;  %v46_v15 = vld [vmem:[#allocation5] sm:$0xff]  ;;  %v45_v16 = vld [vmem:[#allocation2] sm:$0xff] }
  0x11   :  { %v110_v17 = vld [vmem:[%s228_s2] ss:$0 sm:$0xff] }
  0x12   :  { %69 = vmatpush.msra.mxu0 %v58_v3 }
  0x14   :  { %70 = vmatpush.msra.mxu0 %v57_v4 }
  0x16   :  { %71 = vmatpush.msra.mxu0 %v56_v5 }
  0x18   :  { %72 = vmatpush.msra.mxu0 %v55_v6 }
  0x1a   :  { %73 = vmatpush.msra.mxu0 %v54_v7 }
  0x1c   :  { %74 = vmatpush.msra.mxu0 %v53_v8 }
  0x1e   :  { %75 = vmatpush.msra.mxu0 %v52_v9 }
  0x20   :  { %76 = vmatpush.msra.mxu0 %v51_v10 }
  0x22   :  { %77 = vmatpush.msra.mxu0 %v50_v11 }
  0x24   :  { %78 = vmatpush.msra.mxu0 %v49_v12 }
  0x26   :  { %79 = vmatpush.msra.mxu0 %v48_v13 }
  0x28   :  { %80 = vmatpush.msra.mxu0 %v47_v14 }
  0x2a   :  { %81 = vmatpush.msra.mxu0 %v46_v15 }
  0x2b   :  { %82 = vmatmul.f32.vlgmr.msra.gmra.mxu0 %v45_v16 }
  0xa8   :  { %v83_v18 = vpop.f32.mrf.mxu0 }
  0xa9   :  { %v84_v19 = vadd.f32 %v110_v17, %v83_v18 }
  0xab   :  { %86 = vst [vmem:[#allocation7] sm:$0xff] %v84_v19 }
  0xac   :  { %97 = dma.vmem_to_hbm [thread:$0]  %s93_s25, 128, %s95_s28, [#allocation4]  }
  0xad   :  { %187 = dma.done.wait [#allocation4], 128  }
  0xae   :  { %188 = vsyncadd [#allocation4], 4294967168 }
  0xaf   :  { %102 = vsyncpa [#allocation3], 1 }
  0xb0   :  { %103 = vsyncpa [#allocation6], 1 }
  0xb1   :  { %104 = vsyncpa [#allocation4], 1 }

</bundles_post_ra>
